<compile_context>
chip_gen: v5e
topology: v5e:2x2
jax: 0.10.0
libtpu: 0.0.40
codegen_flags: <defaults>
</compile_context>

<pallas_src>
import jax
import jax.numpy as jnp
from jax.experimental import pallas as pl
from jax.experimental.pallas import tpu as pltpu

MAX_TB = 2048  # batch-tile cap; keeps grid-step overhead amortized, VMEM tiny.


def mlp_kernel(x_ref, w1_ref, b1_ref, w2r_ref, b2_ref, o_ref):
    # fc1 on the MXU with f32 accumulation: (TB, in) @ (in, hidden).
    h = jnp.dot(x_ref[...], w1_ref[...], preferred_element_type=jnp.float32)
    h = jnp.maximum(h + b1_ref[...], 0.0)  # bias broadcast over batch + ReLU (VPU)

    # fc2 with output_size == 1: a VPU multiply with the (1, hidden) weight row
    # and an XLU lane reduction over the hidden axis. b2 is an SMEM scalar.
    # TODO(synk): if a bundle dump at large TB shows the XLU lane-reduce as the
    # saturated slot, switch this back to an MXU matmul with w2 padded to
    # (hidden, 128) and store column 0.
    y = jnp.sum(h * w2r_ref[...], axis=-1, keepdims=True) + b2_ref[0, 0]  # (TB, 1)

    # Store the (TB, 1) result directly — last block dim equals the full output
    # dim, so this is legal, and it writes 4 B/row instead of 512 B/row.
    o_ref[...] = y.astype(o_ref.dtype)


def mlp_forward_pallas(x, w1, b1, w2, b2):
    """Fused fc1 -> ReLU -> fc2 forward via one Pallas kernel."""
    B, in_size = x.shape
    hidden = w1.shape[1]
    out_size = w2.shape[1]
    # TODO(synk): kernel is specialized to output_size == 1 (the module spec);
    # a wider fc2 would go back to an MXU matmul with an N-aligned output tile.
    assert out_size == 1, "this kernel is specialized for output_size == 1"

    w2_row = w2.T.reshape(1, hidden)   # (1, hidden) lane-resident weight row
    b2_scalar = b2.reshape(1, 1)       # (1, 1) SMEM scalar

    # Batch tiling: one block when B fits, otherwise 2048-row tiles (multiple
    # of 8) so the grid has >= 2 steps and the "parallel" axis can shard across
    # v7x's two TensorCores. Ragged last tile is clipped on writeback by Pallas;
    # the padded rows only flow through mul/relu/sum, so no NaN can leak.
    if B <= MAX_TB:
        TB = B
    else:
        TB = MAX_TB  # multiple of 8
    grid = (pl.cdiv(B, TB),)

    return pl.pallas_call(
        mlp_kernel,
        out_shape=jax.ShapeDtypeStruct((B, out_size), jnp.float32),
        grid_spec=pltpu.PrefetchScalarGridSpec(
            num_scalar_prefetch=0,
            grid=grid,
            in_specs=[
                pl.BlockSpec((TB, in_size), lambda i: (i, 0)),        # x: tiled over batch
                pl.BlockSpec((in_size, hidden), lambda i: (0, 0)),    # w1: VMEM-resident
                pl.BlockSpec((1, hidden), lambda i: (0, 0)),          # b1: VMEM-resident
                pl.BlockSpec((1, hidden), lambda i: (0, 0)),          # w2 row: VMEM-resident
                pl.BlockSpec(memory_space=pltpu.MemorySpace.SMEM),    # b2: SMEM scalar
            ],
            out_specs=pl.BlockSpec((TB, out_size), lambda i: (i, 0)),
        ),
        compiler_params=pltpu.CompilerParams(
            dimension_semantics=("parallel",),  # batch axis -> 2-TC sharding on v7x
        ),
    )(x, w1, b1, w2_row, b2_scalar)


def mlp_forward(x, w1, b1, w2, b2, *, min_pallas_batch=1024):
    """Dispatcher: tiny batches (launch overhead dominates) use fused XLA."""
    if x.shape[0] < min_pallas_batch:
        return jnp.maximum(x @ w1 + b1, 0.0) @ w2 + b2
    return mlp_forward_pallas(x, w1, b1, w2, b2)


if __name__ == "__main__":
    # Small shapes consistent with the module: batch=8, input_size=32,
    # hidden_size=64, output_size=1.
    B, input_size, hidden_size, output_size = 8, 32, 64, 1

    key = jax.random.PRNGKey(0)
    kx, k1, kb1, k2, kb2 = jax.random.split(key, 5)

    x = jax.random.normal(kx, (B, input_size), dtype=jnp.float32)

    # Deterministic init mimicking nn.Linear's U(-1/sqrt(fan_in), 1/sqrt(fan_in)).
    bound1 = 1.0 / (input_size ** 0.5)
    w1 = jax.random.uniform(k1, (input_size, hidden_size), jnp.float32, -bound1, bound1)
    b1 = jax.random.uniform(kb1, (1, hidden_size), jnp.float32, -bound1, bound1)

    bound2 = 1.0 / (hidden_size ** 0.5)
    w2 = jax.random.uniform(k2, (hidden_size, output_size), jnp.float32, -bound2, bound2)
    b2 = jax.random.uniform(kb2, (1, output_size), jnp.float32, -bound2, bound2)

    # Exercise the Pallas kernel directly (the dispatcher would pick XLA at B=8).
    out = mlp_forward_pallas(x, w1, b1, w2, b2)
    out = jax.block_until_ready(out)

    # Reference check against plain JAX (same semantics as the PyTorch forward).
    ref = jnp.maximum(x @ w1 + b1, 0.0) @ w2 + b2
    assert out.shape == (B, output_size)
    assert jnp.allclose(out, ref, atol=1e-5, rtol=1e-5)

    print("KERNEL_OK")
</pallas_src>

<mosaic_0001>
module attributes {stable_mosaic.version = 11 : i64} {
  func.func @mlp_kernel(%arg0: i32, %arg1: memref<8x32xf32, #tpu.memory_space<vmem>>, %arg2: memref<32x64xf32, #tpu.memory_space<vmem>>, %arg3: memref<1x64xf32, #tpu.memory_space<vmem>>, %arg4: memref<1x64xf32, #tpu.memory_space<vmem>>, %arg5: memref<1x1xf32, #tpu.memory_space<smem>>, %arg6: memref<8x1xf32, #tpu.memory_space<vmem>>) attributes {dimension_semantics = [#tpu.dimension_semantics<parallel>], iteration_bounds = array<i64: 1>, scalar_prefetch = 0 : i64, scratch_operands = 0 : i64, tpu.core_type = #tpu.core_type<tc>, window_params = [{transform_indices = @transform_0, window_bounds = array<i64: 8, 32>}, {pipeline_mode = #tpu.pipeline_mode<synchronous>, transform_indices = @transform_1, window_bounds = array<i64: 32, 64>}, {pipeline_mode = #tpu.pipeline_mode<synchronous>, transform_indices = @transform_2, window_bounds = array<i64: 1, 64>}, {pipeline_mode = #tpu.pipeline_mode<synchronous>, transform_indices = @transform_3, window_bounds = array<i64: 1, 64>}, {transform_indices = @transform_4, window_bounds = array<i64: 1, 1>}, {transform_indices = @transform_5, window_bounds = array<i64: 8, 1>}]} {
    %c0 = arith.constant 0 : index
    %c0_0 = arith.constant 0 : index
    %0 = vector.load %arg1[%c0, %c0_0] : memref<8x32xf32, #tpu.memory_space<vmem>>, vector<8x32xf32>
    %c0_1 = arith.constant 0 : index
    %c0_2 = arith.constant 0 : index
    %1 = vector.load %arg2[%c0_1, %c0_2] : memref<32x64xf32, #tpu.memory_space<vmem>>, vector<32x64xf32>
    %cst = arith.constant dense<0.000000e+00> : vector<8x64xf32>
    %2 = tpu.matmul %0, %1, %cst {dimension_numbers = #tpu.dot_dimension_numbers<[1], [0], [0], [1], [0, 0, 1, 1], [], []>} : vector<8x32xf32>, vector<32x64xf32>, vector<8x64xf32> -> vector<8x64xf32>
    %c0_3 = arith.constant 0 : index
    %c0_4 = arith.constant 0 : index
    %3 = vector.load %arg3[%c0_3, %c0_4] : memref<1x64xf32, #tpu.memory_space<vmem>>, vector<1x64xf32>
    %4 = vector.broadcast %3 : vector<1x64xf32> to vector<8x64xf32>
    %5 = arith.addf %2, %4 : vector<8x64xf32>
    %cst_5 = arith.constant 0.000000e+00 : f32
    %6 = vector.broadcast %cst_5 : f32 to vector<8x64xf32>
    %7 = arith.maximumf %5, %6 : vector<8x64xf32>
    %c0_6 = arith.constant 0 : index
    %c0_7 = arith.constant 0 : index
    %8 = vector.load %arg4[%c0_6, %c0_7] : memref<1x64xf32, #tpu.memory_space<vmem>>, vector<1x64xf32>
    %9 = vector.broadcast %8 : vector<1x64xf32> to vector<8x64xf32>
    %10 = arith.mulf %7, %9 : vector<8x64xf32>
    %cst_8 = arith.constant dense<0.000000e+00> : vector<8xf32>
    %11 = vector.multi_reduction <add>, %10, %cst_8 [1] : vector<8x64xf32> to vector<8xf32>
    %12 = vector.shape_cast %11 : vector<8xf32> to vector<8x1xf32>
    %c0_9 = arith.constant 0 : index
    %c0_10 = arith.constant 0 : index
    %13 = memref.load %arg5[%c0_9, %c0_10] : memref<1x1xf32, #tpu.memory_space<smem>>
    %14 = vector.broadcast %13 : f32 to vector<8x1xf32>
    %15 = arith.addf %12, %14 : vector<8x1xf32>
    %c0_11 = arith.constant 0 : index
    %c0_12 = arith.constant 0 : index
    %16 = vector.load %arg6[%c0_11, %c0_12] : memref<8x1xf32, #tpu.memory_space<vmem>>, vector<8x1xf32>
    tpu.vector_store %arg6[%c0_11, %c0_12], %15 {strides = array<i32>} : memref<8x1xf32, #tpu.memory_space<vmem>>, vector<8x1xf32>,
    return
  }
  func.func @transform_0(%arg0: i32) -> (i32, i32) {
    %c0_i32 = arith.constant 0 : i32
    %c0_i32_0 = arith.constant 0 : i32
    return %arg0, %c0_i32 : i32, i32
  }
  func.func @transform_1(%arg0: i32) -> (i32, i32) {
    %c0_i32 = arith.constant 0 : i32
    %c0_i32_0 = arith.constant 0 : i32
    %c0_i32_1 = arith.constant 0 : i32
    return %c0_i32, %c0_i32_0 : i32, i32
  }
  func.func @transform_2(%arg0: i32) -> (i32, i32) {
    %c0_i32 = arith.constant 0 : i32
    %c0_i32_0 = arith.constant 0 : i32
    %c0_i32_1 = arith.constant 0 : i32
    return %c0_i32, %c0_i32_0 : i32, i32
  }
  func.func @transform_3(%arg0: i32) -> (i32, i32) {
    %c0_i32 = arith.constant 0 : i32
    %c0_i32_0 = arith.constant 0 : i32
    %c0_i32_1 = arith.constant 0 : i32
    return %c0_i32, %c0_i32_0 : i32, i32
  }
  func.func @transform_4(%arg0: i32) -> (i32, i32) {
    %c0_i32 = arith.constant 0 : i32
    %c0_i32_0 = arith.constant 0 : i32
    %c0_i32_1 = arith.constant 0 : i32
    return %c0_i32, %c0_i32_0 : i32, i32
  }
  func.func @transform_5(%arg0: i32) -> (i32, i32) {
    %c0_i32 = arith.constant 0 : i32
    %c0_i32_0 = arith.constant 0 : i32
    return %arg0, %c0_i32 : i32, i32
  }
}

</mosaic_0001>

<bundles_post_ra>
// kernel: tpu_custom_call.1
= control target key start
LH: loop header
LB: loop body
LE: loop exit
PB: predicated region body
PF: predicated region fallthrough
CT: control target
= control target key end

     0   :  { %11 = vsyncpa [#allocation4], 0  ;;  %s216_s0 = inlined_call_operand.hbm [shape: f32[8,32], index: 0, kind: input, shape index: {}]   ;;  %s217_s1 = inlined_call_operand.hbm [shape: f32[32,64], index: 1, kind: input, shape index: {}]   ;;  %s218_s2 = inlined_call_operand.vmem [shape: f32[1,64], index: 2, kind: input, shape index: {}]   ;;  %s219_s3 = inlined_call_operand.vmem [shape: f32[1,64], index: 3, kind: input, shape index: {}]   ;;  %s220_s4 = inlined_call_operand.<no memory space> [shape: f32[1,1], index: 4, kind: input, shape index: {}]   ;;  %s221_s5 = inlined_call_operand.vmem [shape: f32[8,1], index: 5, kind: output, shape index: {}]  }
   0x1   :  { %s18_s20 = sshll.u32 %s216_s0, 4  ;;  %s19_s20 = int_to_ptr.hbm [resolvable:$true] %s18_s20 }
   0x2   :  { %12 = vsyncpa [#allocation6], 0  ;;  %s164_s21 = smov [#allocation3]   ;;  %s28_s25 = sshll.u32 %s217_s1, 4  ;;  %s29_s25 = int_to_ptr.hbm [resolvable:$true] %s28_s25 }
   0x3   :  { %s20_s22 = sshll.u32 %s164_s21, 4  ;;  %s165_s26 = smov [#allocation5]   ;;  %s21_s22 = int_to_ptr.vmem [resolvable:$true] %s20_s22 }
   0x4   :  { %23 = dma.hbm_to_vmem [thread:$0]  %s19_s20, 128, %s21_s22, [#allocation4]  }
   0x5   :  { %s30_s27 = sshll.u32 %s165_s26, 4  ;;  %s166_s28 = smov 128   ;;  %s31_s27 = int_to_ptr.vmem [resolvable:$true] %s30_s27 }
   0x6   :  { %s167_s29 = smov 8  }
   0x7   :  { %36 = dma.hbm_to_vmem [thread:$0]  %s29_s25, 512, %s31_s27, [#allocation6], %s166_s28, %s166_s28, %s167_s29  }
   0x8   :  { %160 = dma.done.wait [#allocation4], 128  }
   0x9   :  { %161 = vsyncadd [#allocation4], 4294967168 }
   0xa   :  { %162 = dma.done.wait [#allocation6], 512  }
   0xb   :  { %163 = vsyncadd [#allocation6], 4294966784  ;;  %v55_v0 = vld [vmem:[#allocation5 + $0x18] sm:$0xff]  ;;  %v54_v1 = vld [vmem:[#allocation5 + $0x10] sm:$0xff]  ;;  %vm60_vm0 = vcmask 261120   ;;  %vm90_vm1 = vcmask 523264   ;;  %v95_v12 = vstv %s220_s4 }
   0xc   :  { %76 = vmatpush.msra.mxu0 %v55_v0  ;;  %v53_v2 = vld [vmem:[#allocation5 + $0x8] sm:$0xff]  ;;  %v52_v3 = vld [vmem:[#allocation5] sm:$0xff]  ;;  %v51_v4 = vld [vmem:[#allocation3] sm:$0xff]  ;;  %vm97_vm2 = vcmask 7168  }
   0xd   :  { %v110_v5 = vld [vmem:[%s218_s2] ss:$0 sm:$0xff] }
   0xe   :  { %77 = vmatpush.msra.mxu0 %v54_v1  ;;  %v111_v8 = vld [vmem:[%s219_s3] ss:$0 sm:$0xff] }
  0x10   :  { %78 = vmatpush.msra.mxu0 %v53_v2 }
  0x12   :  { %79 = vmatpush.msra.mxu0 %v52_v3 }
  0x13   :  { %105 = vmatmul.msk.f32.vlgmr.msra.gmra.mxu0 %vm60_vm0, %v51_v4 }
  0x90   :  { %v81_v6 = vpop.f32.mrf.mxu0 }
  0x91   :  { %v82_v7 = vadd.f32 %v110_v5, %v81_v6 }
  0x93   :  { %v84_v9 = vmax.f32 %v82_v7, 0.0 }
  0x95   :  { %v89_v10 = vmul.f32 %v111_v8, %v84_v9 }
  0x97   :  { %v91_v11 = vsel %vm90_vm1, %v89_v10, 0.0 }
  0x98   :  { %92 = vadd.xlane.f32.xlu0 %v91_v11 }
 0x10b   :  { %v93_v13 = vpop.xlane.xlu0 %92 }
 0x10c   :  { %v96_v14 = vadd.f32 %v95_v12, %v93_v13 }
 0x10e   :  { %98 = vst.msk [vmem:[%s221_s5] sm:$0xff] %vm97_vm2, %v96_v14 }
 0x10f   :  { %103 = vsyncpa [#allocation4], 1 }
 0x110   :  { %104 = vsyncpa [#allocation6], 1 }

</bundles_post_ra>
